<compile_context>
chip_gen: v6e
topology: v6e:2x2x1
jax: 0.10.0
libtpu: 0.0.40
codegen_flags: <defaults>
</compile_context>

<pallas_src>
import jax
import jax.numpy as jnp
from jax.experimental import pallas as pl
from jax.experimental.pallas import tpu as pltpu


N_INPUT = 2
N_OUTPUT = 1
NEURON = 50          # neuron_per_layer
BATCH = 64

# batch tile used only for large batches; small batches run in one shot.
TB_LARGE = 512


def _mlp_kernel(x_ref,
                w1, w2, w3, w4, w5, w6, w7, w8t,
                b1, b2, b3, b4, b5, b6, b7, b8,
                o_ref):
    x = x_ref[...]

    # --- layer 1: K = n_input = 2 contraction on the VPU (broadcast FMAs)
    #     instead of paying an MXU push/pop round-trip for a tiny K.
    w1v = w1[...]
    h = b1[...]
    for k in range(N_INPUT):
        h = h + x[:, k:k + 1] * w1v[k:k + 1, :]
    h = jnp.tanh(h)

    # --- hidden layers 2..7: MXU matmul + bias + tanh
    for w, b in ((w2, b2), (w3, b3), (w4, b4), (w5, b5), (w6, b6), (w7, b7)):
        h = jnp.tanh(
            jnp.dot(h, w[...], preferred_element_type=jnp.float32) + b[...]
        )

    # --- layer 8: single output column -> VPU multiply + lane reduction
    #     (w8t is pre-transposed to (1, NEURON) in the wrapper).
    o_ref[...] = (
        jnp.sum(h * w8t[...], axis=-1, keepdims=True) + b8[...]
    ).astype(o_ref.dtype)


def nn_forward(x, weights, biases):
    """x: (B, n_input) f32.  weights[i]: (in_i, out_i).  biases[i]: (1, out_i)."""
    B = x.shape[0]

    # pre-transpose last-layer weight to (1, NEURON) for the VPU reduction.
    w8t = weights[7].reshape(1, NEURON)
    params = list(weights[:7]) + [w8t] + list(biases)

    # tile choice: run small batches in ONE invocation; tile large batches at
    # >=512 rows (keeps >=2 programs so "parallel" shards across v7x's 2 TCs).
    tb = B if B <= TB_LARGE else TB_LARGE

    pad = (-B) % tb
    if pad:
        x = jnp.pad(x, ((0, pad), (0, 0)))
    bp = B + pad
    grid = (bp // tb,)

    def whole(arr):
        # full-array resident block for parameters (tiny, fits VMEM easily;
        # constant index_map -> fetched once, not per grid step).
        return pl.BlockSpec(arr.shape, lambda i: (0,) * arr.ndim)

    in_specs = (
        [pl.BlockSpec((tb, N_INPUT), lambda i: (i, 0))]
        + [whole(p) for p in params]
    )
    out_spec = pl.BlockSpec((tb, N_OUTPUT), lambda i: (i, 0))

    out = pl.pallas_call(
        _mlp_kernel,
        out_shape=jax.ShapeDtypeStruct((bp, N_OUTPUT), jnp.float32),
        grid_spec=pl.GridSpec(
            grid=grid,
            in_specs=in_specs,
            out_specs=out_spec,
        ),
        compiler_params=pltpu.CompilerParams(
            dimension_semantics=("parallel",)),
    )(x, *params)

    return out[:B] if pad else out


def init_params(key):
    """Deterministic init mimicking PyTorch nn.Linear default U(-1/sqrt(fan_in), +)."""
    dims = [N_INPUT] + [NEURON] * 7 + [N_OUTPUT]
    weights, biases = [], []
    for i in range(8):
        fan_in, fan_out = dims[i], dims[i + 1]
        key, kw, kb = jax.random.split(key, 3)
        bound = 1.0 / jnp.sqrt(fan_in)
        w = jax.random.uniform(kw, (fan_in, fan_out), jnp.float32, -bound, bound)
        b = jax.random.uniform(kb, (1, fan_out), jnp.float32, -bound, bound)
        weights.append(w)
        biases.append(b)
    return weights, biases


def reference_forward(x, weights, biases):
    h = x
    for i in range(7):
        h = jnp.tanh(h @ weights[i] + biases[i])
    return h @ weights[7] + biases[7]


if __name__ == "__main__":
    key = jax.random.PRNGKey(0)
    key, kx = jax.random.split(key)
    x = jax.random.normal(kx, (BATCH, N_INPUT), jnp.float32)

    weights, biases = init_params(key)

    out = jax.block_until_ready(nn_forward(x, weights, biases))

    ref = reference_forward(x, weights, biases)
    assert out.shape == (BATCH, N_OUTPUT)
    assert jnp.allclose(out, ref, atol=2e-5, rtol=1e-4)

    print("KERNEL_OK")
</pallas_src>

<mosaic_0001>
module attributes {stable_mosaic.version = 11 : i64} {
  func.func @_mlp_kernel(%arg0: i32, %arg1: memref<64x2xf32, #tpu.memory_space<vmem>>, %arg2: memref<2x50xf32, #tpu.memory_space<vmem>>, %arg3: memref<50x50xf32, #tpu.memory_space<vmem>>, %arg4: memref<50x50xf32, #tpu.memory_space<vmem>>, %arg5: memref<50x50xf32, #tpu.memory_space<vmem>>, %arg6: memref<50x50xf32, #tpu.memory_space<vmem>>, %arg7: memref<50x50xf32, #tpu.memory_space<vmem>>, %arg8: memref<50x50xf32, #tpu.memory_space<vmem>>, %arg9: memref<1x50xf32, #tpu.memory_space<vmem>>, %arg10: memref<1x50xf32, #tpu.memory_space<vmem>>, %arg11: memref<1x50xf32, #tpu.memory_space<vmem>>, %arg12: memref<1x50xf32, #tpu.memory_space<vmem>>, %arg13: memref<1x50xf32, #tpu.memory_space<vmem>>, %arg14: memref<1x50xf32, #tpu.memory_space<vmem>>, %arg15: memref<1x50xf32, #tpu.memory_space<vmem>>, %arg16: memref<1x50xf32, #tpu.memory_space<vmem>>, %arg17: memref<1x1xf32, #tpu.memory_space<vmem>>, %arg18: memref<64x1xf32, #tpu.memory_space<vmem>>) attributes {dimension_semantics = [#tpu.dimension_semantics<parallel>], iteration_bounds = array<i64: 1>, scalar_prefetch = 0 : i64, scratch_operands = 0 : i64, tpu.core_type = #tpu.core_type<tc>, window_params = [{transform_indices = @transform_0, window_bounds = array<i64: 64, 2>}, {pipeline_mode = #tpu.pipeline_mode<synchronous>, transform_indices = @transform_1, window_bounds = array<i64: 2, 50>}, {pipeline_mode = #tpu.pipeline_mode<synchronous>, transform_indices = @transform_2, window_bounds = array<i64: 50, 50>}, {pipeline_mode = #tpu.pipeline_mode<synchronous>, transform_indices = @transform_3, window_bounds = array<i64: 50, 50>}, {pipeline_mode = #tpu.pipeline_mode<synchronous>, transform_indices = @transform_4, window_bounds = array<i64: 50, 50>}, {pipeline_mode = #tpu.pipeline_mode<synchronous>, transform_indices = @transform_5, window_bounds = array<i64: 50, 50>}, {pipeline_mode = #tpu.pipeline_mode<synchronous>, transform_indices = @transform_6, window_bounds = array<i64: 50, 50>}, {pipeline_mode = #tpu.pipeline_mode<synchronous>, transform_indices = @transform_7, window_bounds = array<i64: 50, 50>}, {pipeline_mode = #tpu.pipeline_mode<synchronous>, transform_indices = @transform_8, window_bounds = array<i64: 1, 50>}, {pipeline_mode = #tpu.pipeline_mode<synchronous>, transform_indices = @transform_9, window_bounds = array<i64: 1, 50>}, {pipeline_mode = #tpu.pipeline_mode<synchronous>, transform_indices = @transform_10, window_bounds = array<i64: 1, 50>}, {pipeline_mode = #tpu.pipeline_mode<synchronous>, transform_indices = @transform_11, window_bounds = array<i64: 1, 50>}, {pipeline_mode = #tpu.pipeline_mode<synchronous>, transform_indices = @transform_12, window_bounds = array<i64: 1, 50>}, {pipeline_mode = #tpu.pipeline_mode<synchronous>, transform_indices = @transform_13, window_bounds = array<i64: 1, 50>}, {pipeline_mode = #tpu.pipeline_mode<synchronous>, transform_indices = @transform_14, window_bounds = array<i64: 1, 50>}, {pipeline_mode = #tpu.pipeline_mode<synchronous>, transform_indices = @transform_15, window_bounds = array<i64: 1, 50>}, {pipeline_mode = #tpu.pipeline_mode<synchronous>, transform_indices = @transform_16, window_bounds = array<i64: 1, 1>}, {transform_indices = @transform_17, window_bounds = array<i64: 64, 1>}]} {
    %c0 = arith.constant 0 : index
    %c0_0 = arith.constant 0 : index
    %0 = vector.load %arg1[%c0, %c0_0] : memref<64x2xf32, #tpu.memory_space<vmem>>, vector<64x2xf32>
    %c0_1 = arith.constant 0 : index
    %c0_2 = arith.constant 0 : index
    %1 = vector.load %arg2[%c0_1, %c0_2] : memref<2x50xf32, #tpu.memory_space<vmem>>, vector<2x50xf32>
    %c0_3 = arith.constant 0 : index
    %c0_4 = arith.constant 0 : index
    %2 = vector.load %arg10[%c0_3, %c0_4] : memref<1x50xf32, #tpu.memory_space<vmem>>, vector<1x50xf32>
    %3 = vector.extract_strided_slice %0 {offsets = [0, 0], sizes = [64, 1], strides = [1, 1]} : vector<64x2xf32> to vector<64x1xf32>
    %4 = vector.extract_strided_slice %1 {offsets = [0, 0], sizes = [1, 50], strides = [1, 1]} : vector<2x50xf32> to vector<1x50xf32>
    %5 = vector.broadcast %3 : vector<64x1xf32> to vector<64x50xf32>
    %6 = vector.broadcast %4 : vector<1x50xf32> to vector<64x50xf32>
    %7 = arith.mulf %5, %6 : vector<64x50xf32>
    %8 = vector.broadcast %2 : vector<1x50xf32> to vector<64x50xf32>
    %9 = arith.addf %8, %7 : vector<64x50xf32>
    %10 = vector.extract_strided_slice %0 {offsets = [0, 1], sizes = [64, 1], strides = [1, 1]} : vector<64x2xf32> to vector<64x1xf32>
    %11 = vector.extract_strided_slice %1 {offsets = [1, 0], sizes = [1, 50], strides = [1, 1]} : vector<2x50xf32> to vector<1x50xf32>
    %12 = vector.broadcast %10 : vector<64x1xf32> to vector<64x50xf32>
    %13 = vector.broadcast %11 : vector<1x50xf32> to vector<64x50xf32>
    %14 = arith.mulf %12, %13 : vector<64x50xf32>
    %15 = arith.addf %9, %14 : vector<64x50xf32>
    %16 = math.tanh %15 : vector<64x50xf32>
    %c0_5 = arith.constant 0 : index
    %c0_6 = arith.constant 0 : index
    %17 = vector.load %arg3[%c0_5, %c0_6] : memref<50x50xf32, #tpu.memory_space<vmem>>, vector<50x50xf32>
    %cst = arith.constant dense<0.000000e+00> : vector<64x50xf32>
    %18 = tpu.matmul %16, %17, %cst {dimension_numbers = #tpu.dot_dimension_numbers<[1], [0], [0], [1], [0, 0, 1, 1], [], []>} : vector<64x50xf32>, vector<50x50xf32>, vector<64x50xf32> -> vector<64x50xf32>
    %c0_7 = arith.constant 0 : index
    %c0_8 = arith.constant 0 : index
    %19 = vector.load %arg11[%c0_7, %c0_8] : memref<1x50xf32, #tpu.memory_space<vmem>>, vector<1x50xf32>
    %20 = vector.broadcast %19 : vector<1x50xf32> to vector<64x50xf32>
    %21 = arith.addf %18, %20 : vector<64x50xf32>
    %22 = math.tanh %21 : vector<64x50xf32>
    %c0_9 = arith.constant 0 : index
    %c0_10 = arith.constant 0 : index
    %23 = vector.load %arg4[%c0_9, %c0_10] : memref<50x50xf32, #tpu.memory_space<vmem>>, vector<50x50xf32>
    %cst_11 = arith.constant dense<0.000000e+00> : vector<64x50xf32>
    %24 = tpu.matmul %22, %23, %cst_11 {dimension_numbers = #tpu.dot_dimension_numbers<[1], [0], [0], [1], [0, 0, 1, 1], [], []>} : vector<64x50xf32>, vector<50x50xf32>, vector<64x50xf32> -> vector<64x50xf32>
    %c0_12 = arith.constant 0 : index
    %c0_13 = arith.constant 0 : index
    %25 = vector.load %arg12[%c0_12, %c0_13] : memref<1x50xf32, #tpu.memory_space<vmem>>, vector<1x50xf32>
    %26 = vector.broadcast %25 : vector<1x50xf32> to vector<64x50xf32>
    %27 = arith.addf %24, %26 : vector<64x50xf32>
    %28 = math.tanh %27 : vector<64x50xf32>
    %c0_14 = arith.constant 0 : index
    %c0_15 = arith.constant 0 : index
    %29 = vector.load %arg5[%c0_14, %c0_15] : memref<50x50xf32, #tpu.memory_space<vmem>>, vector<50x50xf32>
    %cst_16 = arith.constant dense<0.000000e+00> : vector<64x50xf32>
    %30 = tpu.matmul %28, %29, %cst_16 {dimension_numbers = #tpu.dot_dimension_numbers<[1], [0], [0], [1], [0, 0, 1, 1], [], []>} : vector<64x50xf32>, vector<50x50xf32>, vector<64x50xf32> -> vector<64x50xf32>
    %c0_17 = arith.constant 0 : index
    %c0_18 = arith.constant 0 : index
    %31 = vector.load %arg13[%c0_17, %c0_18] : memref<1x50xf32, #tpu.memory_space<vmem>>, vector<1x50xf32>
    %32 = vector.broadcast %31 : vector<1x50xf32> to vector<64x50xf32>
    %33 = arith.addf %30, %32 : vector<64x50xf32>
    %34 = math.tanh %33 : vector<64x50xf32>
    %c0_19 = arith.constant 0 : index
    %c0_20 = arith.constant 0 : index
    %35 = vector.load %arg6[%c0_19, %c0_20] : memref<50x50xf32, #tpu.memory_space<vmem>>, vector<50x50xf32>
    %cst_21 = arith.constant dense<0.000000e+00> : vector<64x50xf32>
    %36 = tpu.matmul %34, %35, %cst_21 {dimension_numbers = #tpu.dot_dimension_numbers<[1], [0], [0], [1], [0, 0, 1, 1], [], []>} : vector<64x50xf32>, vector<50x50xf32>, vector<64x50xf32> -> vector<64x50xf32>
    %c0_22 = arith.constant 0 : index
    %c0_23 = arith.constant 0 : index
    %37 = vector.load %arg14[%c0_22, %c0_23] : memref<1x50xf32, #tpu.memory_space<vmem>>, vector<1x50xf32>
    %38 = vector.broadcast %37 : vector<1x50xf32> to vector<64x50xf32>
    %39 = arith.addf %36, %38 : vector<64x50xf32>
    %40 = math.tanh %39 : vector<64x50xf32>
    %c0_24 = arith.constant 0 : index
    %c0_25 = arith.constant 0 : index
    %41 = vector.load %arg7[%c0_24, %c0_25] : memref<50x50xf32, #tpu.memory_space<vmem>>, vector<50x50xf32>
    %cst_26 = arith.constant dense<0.000000e+00> : vector<64x50xf32>
    %42 = tpu.matmul %40, %41, %cst_26 {dimension_numbers = #tpu.dot_dimension_numbers<[1], [0], [0], [1], [0, 0, 1, 1], [], []>} : vector<64x50xf32>, vector<50x50xf32>, vector<64x50xf32> -> vector<64x50xf32>
    %c0_27 = arith.constant 0 : index
    %c0_28 = arith.constant 0 : index
    %43 = vector.load %arg15[%c0_27, %c0_28] : memref<1x50xf32, #tpu.memory_space<vmem>>, vector<1x50xf32>
    %44 = vector.broadcast %43 : vector<1x50xf32> to vector<64x50xf32>
    %45 = arith.addf %42, %44 : vector<64x50xf32>
    %46 = math.tanh %45 : vector<64x50xf32>
    %c0_29 = arith.constant 0 : index
    %c0_30 = arith.constant 0 : index
    %47 = vector.load %arg8[%c0_29, %c0_30] : memref<50x50xf32, #tpu.memory_space<vmem>>, vector<50x50xf32>
    %cst_31 = arith.constant dense<0.000000e+00> : vector<64x50xf32>
    %48 = tpu.matmul %46, %47, %cst_31 {dimension_numbers = #tpu.dot_dimension_numbers<[1], [0], [0], [1], [0, 0, 1, 1], [], []>} : vector<64x50xf32>, vector<50x50xf32>, vector<64x50xf32> -> vector<64x50xf32>
    %c0_32 = arith.constant 0 : index
    %c0_33 = arith.constant 0 : index
    %49 = vector.load %arg16[%c0_32, %c0_33] : memref<1x50xf32, #tpu.memory_space<vmem>>, vector<1x50xf32>
    %50 = vector.broadcast %49 : vector<1x50xf32> to vector<64x50xf32>
    %51 = arith.addf %48, %50 : vector<64x50xf32>
    %52 = math.tanh %51 : vector<64x50xf32>
    %c0_34 = arith.constant 0 : index
    %c0_35 = arith.constant 0 : index
    %53 = vector.load %arg9[%c0_34, %c0_35] : memref<1x50xf32, #tpu.memory_space<vmem>>, vector<1x50xf32>
    %54 = vector.broadcast %53 : vector<1x50xf32> to vector<64x50xf32>
    %55 = arith.mulf %52, %54 : vector<64x50xf32>
    %cst_36 = arith.constant dense<0.000000e+00> : vector<64xf32>
    %56 = vector.multi_reduction <add>, %55, %cst_36 [1] : vector<64x50xf32> to vector<64xf32>
    %57 = vector.shape_cast %56 : vector<64xf32> to vector<64x1xf32>
    %c0_37 = arith.constant 0 : index
    %c0_38 = arith.constant 0 : index
    %58 = vector.load %arg17[%c0_37, %c0_38] : memref<1x1xf32, #tpu.memory_space<vmem>>, vector<1x1xf32>
    %59 = vector.broadcast %58 : vector<1x1xf32> to vector<64x1xf32>
    %60 = arith.addf %57, %59 : vector<64x1xf32>
    %c0_39 = arith.constant 0 : index
    %c0_40 = arith.constant 0 : index
    %61 = vector.load %arg18[%c0_39, %c0_40] : memref<64x1xf32, #tpu.memory_space<vmem>>, vector<64x1xf32>
    tpu.vector_store %arg18[%c0_39, %c0_40], %60 {strides = array<i32>} : memref<64x1xf32, #tpu.memory_space<vmem>>, vector<64x1xf32>,
    return
  }
  func.func @transform_0(%arg0: i32) -> (i32, i32) {
    %c0_i32 = arith.constant 0 : i32
    %c0_i32_0 = arith.constant 0 : i32
    return %arg0, %c0_i32 : i32, i32
  }
  func.func @transform_1(%arg0: i32) -> (i32, i32) {
    %c0_i32 = arith.constant 0 : i32
    %c0_i32_0 = arith.constant 0 : i32
    %c0_i32_1 = arith.constant 0 : i32
    return %c0_i32, %c0_i32_0 : i32, i32
  }
  func.func @transform_2(%arg0: i32) -> (i32, i32) {
    %c0_i32 = arith.constant 0 : i32
    %c0_i32_0 = arith.constant 0 : i32
    %c0_i32_1 = arith.constant 0 : i32
    return %c0_i32, %c0_i32_0 : i32, i32
  }
  func.func @transform_3(%arg0: i32) -> (i32, i32) {
    %c0_i32 = arith.constant 0 : i32
    %c0_i32_0 = arith.constant 0 : i32
    %c0_i32_1 = arith.constant 0 : i32
    return %c0_i32, %c0_i32_0 : i32, i32
  }
  func.func @transform_4(%arg0: i32) -> (i32, i32) {
    %c0_i32 = arith.constant 0 : i32
    %c0_i32_0 = arith.constant 0 : i32
    %c0_i32_1 = arith.constant 0 : i32
    return %c0_i32, %c0_i32_0 : i32, i32
  }
  func.func @transform_5(%arg0: i32) -> (i32, i32) {
    %c0_i32 = arith.constant 0 : i32
    %c0_i32_0 = arith.constant 0 : i32
    %c0_i32_1 = arith.constant 0 : i32
    return %c0_i32, %c0_i32_0 : i32, i32
  }
  func.func @transform_6(%arg0: i32) -> (i32, i32) {
    %c0_i32 = arith.constant 0 : i32
    %c0_i32_0 = arith.constant 0 : i32
    %c0_i32_1 = arith.constant 0 : i32
    return %c0_i32, %c0_i32_0 : i32, i32
  }
  func.func @transform_7(%arg0: i32) -> (i32, i32) {
    %c0_i32 = arith.constant 0 : i32
    %c0_i32_0 = arith.constant 0 : i32
    %c0_i32_1 = arith.constant 0 : i32
    return %c0_i32, %c0_i32_0 : i32, i32
  }
  func.func @transform_8(%arg0: i32) -> (i32, i32) {
    %c0_i32 = arith.constant 0 : i32
    %c0_i32_0 = arith.constant 0 : i32
    %c0_i32_1 = arith.constant 0 : i32
    return %c0_i32, %c0_i32_0 : i32, i32
  }
  func.func @transform_9(%arg0: i32) -> (i32, i32) {
    %c0_i32 = arith.constant 0 : i32
    %c0_i32_0 = arith.constant 0 : i32
    %c0_i32_1 = arith.constant 0 : i32
    return %c0_i32, %c0_i32_0 : i32, i32
  }
  func.func @transform_10(%arg0: i32) -> (i32, i32) {
    %c0_i32 = arith.constant 0 : i32
    %c0_i32_0 = arith.constant 0 : i32
    %c0_i32_1 = arith.constant 0 : i32
    return %c0_i32, %c0_i32_0 : i32, i32
  }
  func.func @transform_11(%arg0: i32) -> (i32, i32) {
    %c0_i32 = arith.constant 0 : i32
    %c0_i32_0 = arith.constant 0 : i32
    %c0_i32_1 = arith.constant 0 : i32
    return %c0_i32, %c0_i32_0 : i32, i32
  }
  func.func @transform_12(%arg0: i32) -> (i32, i32) {
    %c0_i32 = arith.constant 0 : i32
    %c0_i32_0 = arith.constant 0 : i32
    %c0_i32_1 = arith.constant 0 : i32
    return %c0_i32, %c0_i32_0 : i32, i32
  }
  func.func @transform_13(%arg0: i32) -> (i32, i32) {
    %c0_i32 = arith.constant 0 : i32
    %c0_i32_0 = arith.constant 0 : i32
    %c0_i32_1 = arith.constant 0 : i32
    return %c0_i32, %c0_i32_0 : i32, i32
  }
  func.func @transform_14(%arg0: i32) -> (i32, i32) {
    %c0_i32 = arith.constant 0 : i32
    %c0_i32_0 = arith.constant 0 : i32
    %c0_i32_1 = arith.constant 0 : i32
    return %c0_i32, %c0_i32_0 : i32, i32
  }
  func.func @transform_15(%arg0: i32) -> (i32, i32) {
    %c0_i32 = arith.constant 0 : i32
    %c0_i32_0 = arith.constant 0 : i32
    %c0_i32_1 = arith.constant 0 : i32
    return %c0_i32, %c0_i32_0 : i32, i32
  }
  func.func @transform_16(%arg0: i32) -> (i32, i32) {
    %c0_i32 = arith.constant 0 : i32
    %c0_i32_0 = arith.constant 0 : i32
    %c0_i32_1 = arith.constant 0 : i32
    return %c0_i32, %c0_i32_0 : i32, i32
  }
  func.func @transform_17(%arg0: i32) -> (i32, i32) {
    %c0_i32 = arith.constant 0 : i32
    %c0_i32_0 = arith.constant 0 : i32
    return %arg0, %c0_i32 : i32, i32
  }
}

</mosaic_0001>

<bundles_post_ra>
// kernel: tpu_custom_call.1
= control target key start
LH: loop header
LB: loop body
LE: loop exit
PB: predicated region body
PF: predicated region fallthrough
CT: control target
= control target key end

     0   :  { %s2119_s0 = inlined_call_operand.vmem [shape: f32[64,2], index: 0, kind: input, shape index: {}]   ;;  %s2120_s1 = inlined_call_operand.vmem [shape: f32[2,50], index: 1, kind: input, shape index: {}]   ;;  %s2121_s2 = inlined_call_operand.vmem [shape: f32[50,50], index: 2, kind: input, shape index: {}]   ;;  %s2122_s3 = inlined_call_operand.hbm [shape: f32[50,50], index: 3, kind: input, shape index: {}]   ;;  %s2123_s4 = inlined_call_operand.hbm [shape: f32[50,50], index: 4, kind: input, shape index: {}]   ;;  %s2124_s5 = inlined_call_operand.hbm [shape: f32[50,50], index: 5, kind: input, shape index: {}]   ;;  %s2125_s6 = inlined_call_operand.hbm [shape: f32[50,50], index: 6, kind: input, shape index: {}]   ;;  %s2126_s7 = inlined_call_operand.hbm [shape: f32[50,50], index: 7, kind: input, shape index: {}]   ;;  %s2127_s8 = inlined_call_operand.vmem [shape: f32[1,50], index: 8, kind: input, shape index: {}]   ;;  %s2128_s9 = inlined_call_operand.vmem [shape: f32[1,50], index: 9, kind: input, shape index: {}]   ;;  %s2129_s10 = inlined_call_operand.vmem [shape: f32[1,50], index: 10, kind: input, shape index: {}]   ;;  %s2130_s11 = inlined_call_operand.vmem [shape: f32[1,50], index: 11, kind: input, shape index: {}]   ;;  %s2131_s12 = inlined_call_operand.vmem [shape: f32[1,50], index: 12, kind: input, shape index: {}]   ;;  %s2132_s13 = inlined_call_operand.vmem [shape: f32[1,50], index: 13, kind: input, shape index: {}]   ;;  %s2133_s14 = inlined_call_operand.vmem [shape: f32[1,50], index: 14, kind: input, shape index: {}]   ;;  %s2134_s15 = inlined_call_operand.vmem [shape: f32[1,50], index: 15, kind: input, shape index: {}]   ;;  %s2135_s16 = inlined_call_operand.<no memory space> [shape: f32[1,1], index: 16, kind: input, shape index: {}]   ;;  %s2136_s17 = inlined_call_operand.vmem [shape: f32[64,1], index: 17, kind: output, shape index: {}]  }
   0x1   :  { %2138 = sst [smem:[#allocation14_spill]] %s2119_s0  ;;  %v22_v0 = vstv %s2135_s16 }
   0x2   :  { %2139 = sst [smem:[#allocation15_spill]] %s2120_s1  ;;  %23 = vst [vmem:[#allocation2] sm:$0x1] %v22_v0 }
   0x3   :  { %24 = vsyncpa [#allocation4], 0 }
   0x4   :  { %25 = vsyncpa [#allocation6], 0 }
   0x5   :  { %26 = vsyncpa [#allocation9], 0  ;;  %s1805_s26 = smov [#allocation5]   ;;  %s1806_s28 = smov [#allocation8]  }
   0x6   :  { %s50_s27 = sshll.u32 %s1805_s26, 4  ;;  %s74_s29 = sshll.u32 %s1806_s28, 4  ;;  %s51_s27 = int_to_ptr.vmem [resolvable:$true] %s50_s27  ;;  %s75_s29 = int_to_ptr.vmem [resolvable:$true] %s74_s29 }
   0x7   :  { %s1707_s0 = scalar_lea.vmem %s51_s27, 896  ;;  %p1712_p1 = scmp.lt.s32.totalorder %s51_s27, %s51_s27 }
   0x8   :  { %p1708_p0 = scmp.ne.s32.totalorder %s51_s27, %s1707_s0  ;;  %p1713_p2 = scmp.lt.s32.totalorder %s1707_s0, %s1707_s0 }
   0xa   :  { %p1714_p3 = por %p1713_p2, %p1712_p1 }
   0xc   :  { %p1715_p4 = pnand %p1714_p3, %p1708_p0 }
   0xe   :  { %1718 = shalt.err (!%p1715_p4)
}
   0xf   :  { %s1807_s30 = smov 128   ;;  %s1808_s18 = smov 8  }
  0x10   :  { %56 = dma.hbm_to_vmem [thread:$0]  %s2123_s4, 896, %s51_s27, [#allocation6], %s1807_s30, %s1807_s30, %s1808_s18  }
  0x11   :  { %s1727_s1 = scalar_lea.vmem %s75_s29, 896  ;;  %p1732_p6 = scmp.lt.s32.totalorder %s75_s29, %s75_s29 }
  0x12   :  { %p1728_p5 = scmp.ne.s32.totalorder %s75_s29, %s1727_s1  ;;  %p1733_p7 = scmp.lt.s32.totalorder %s1727_s1, %s1727_s1 }
  0x14   :  { %p1734_p8 = por %p1733_p7, %p1732_p6 }
  0x16   :  { %p1735_p9 = pnand %p1734_p8, %p1728_p5 }
  0x18   :  { %1738 = shalt.err (!%p1735_p9)
}
  0x19   :  { %80 = dma.hbm_to_vmem [thread:$0]  %s2125_s6, 896, %s75_s29, [#allocation9], %s1807_s30, %s1807_s30, %s1808_s18  }
  0x1a   :  { %s1809_s22 = smov [#allocation3]   ;;  %s1810_s24 = smov [#allocation7]  }
  0x1b   :  { %s38_s23 = sshll.u32 %s1809_s22, 4  ;;  %s62_s25 = sshll.u32 %s1810_s24, 4  ;;  %s39_s23 = int_to_ptr.vmem [resolvable:$true] %s38_s23  ;;  %s63_s25 = int_to_ptr.vmem [resolvable:$true] %s62_s25 }
  0x1c   :  { %s1747_s4 = scalar_lea.vmem %s39_s23, 896  ;;  %p1752_p11 = scmp.lt.s32.totalorder %s39_s23, %s39_s23 }
  0x1d   :  { %p1748_p10 = scmp.ne.s32.totalorder %s39_s23, %s1747_s4  ;;  %p1753_p12 = scmp.lt.s32.totalorder %s1747_s4, %s1747_s4 }
  0x1f   :  { %p1754_p13 = por %p1753_p12, %p1752_p11 }
  0x21   :  { %p1755_p0 = pnand %p1754_p13, %p1748_p10 }
  0x23   :  { %1758 = shalt.err (!%p1755_p0)
}
  0x24   :  { %44 = dma.hbm_to_vmem [thread:$0]  %s2122_s3, 896, %s39_s23, [#allocation4], %s1807_s30, %s1807_s30, %s1808_s18  }
  0x25   :  { %s1767_s6 = scalar_lea.vmem %s63_s25, 896  ;;  %p1772_p2 = scmp.lt.s32.totalorder %s63_s25, %s63_s25 }
  0x26   :  { %p1768_p1 = scmp.ne.s32.totalorder %s63_s25, %s1767_s6  ;;  %p1773_p3 = scmp.lt.s32.totalorder %s1767_s6, %s1767_s6 }
  0x28   :  { %p1774_p4 = por %p1773_p3, %p1772_p2 }
  0x2a   :  { %p1775_p5 = pnand %p1774_p4, %p1768_p1 }
  0x2c   :  { %1778 = shalt.err (!%p1775_p5)
}
  0x2d   :  { %68 = dma.hbm_to_vmem [thread:$0]  %s2124_s5, 896, %s63_s25, [#allocation6], %s1807_s30, %s1807_s30, %s1808_s18  }
  0x2e   :  { %s1811_s0 = smov [#allocation10]  }
  0x2f   :  { %s86_s16 = sshll.u32 %s1811_s0, 4  ;;  %s87_s16 = int_to_ptr.vmem [resolvable:$true] %s86_s16 }
  0x30   :  { %s1787_s19 = scalar_lea.vmem %s87_s16, 896  ;;  %p1792_p7 = scmp.lt.s32.totalorder %s87_s16, %s87_s16 }
  0x31   :  { %p1788_p6 = scmp.ne.s32.totalorder %s87_s16, %s1787_s19  ;;  %p1793_p8 = scmp.lt.s32.totalorder %s1787_s19, %s1787_s19 }
  0x33   :  { %p1794_p9 = por %p1793_p8, %p1792_p7 }
  0x35   :  { %p1795_p10 = pnand %p1794_p9, %p1788_p6 }
  0x37   :  { %1798 = shalt.err (!%p1795_p10)
}
  0x38   :  { %92 = dma.hbm_to_vmem [thread:$0]  %s2126_s7, 896, %s87_s16, [#allocation9], %s1807_s30, %s1807_s30, %s1808_s18  }
  0x39   :  { %1799 = dma.done.wait [#allocation4], 896  }
  0x3a   :  { %1800 = vsyncadd [#allocation4], 4294966400 }
  0x3b   :  { %1801 = dma.done.wait [#allocation6], 1792  }
  0x3c   :  { %1802 = vsyncadd [#allocation6], 4294965504 }
  0x3d   :  { %1803 = dma.done.wait [#allocation9], 1792  }
  0x3e   :  { %1804 = vsyncadd [#allocation9], 4294965504  ;;  %v1812_v1 = vmov 1   ;;  %v1813_v2 = vmov 0   ;;  %s2140_s21 = sld [smem:[#allocation14_spill]]  ;;  %vm301_vm0 = vcmask 1041408   ;;  %v176_v18 = vlaneseq }
  0x3f   :  { %1577 = vset.pattern.permute.xlu1 %v1812_v1  ;;  %1576 = vset.pattern.permute.xlu0 %v1813_v2  ;;  %v268_v7 = vld [vmem:[%s2121_s2 + $0x30] sm:$0x3]  ;;  %v267_v8 = vld [vmem:[%s2121_s2 + $0x28] sm:$0xff]  ;;  %v266_v10 = vld [vmem:[%s2121_s2 + $0x20] sm:$0xff]  ;;  %s2141_s27 = sld [smem:[#allocation15_spill]]  ;;  %vm276_vm1 = vcmask 408576  }
  0x40   :  { %1411 = vmatprep.subr.msk.mxu0 %vm301_vm0, %v268_v7  ;;  %v265_v12 = vld [vmem:[%s2121_s2 + $0x18] sm:$0xff]  ;;  %v264_v14 = vld [vmem:[%s2121_s2 + $0x10] sm:$0xff]  ;;  %v263_v15 = vld [vmem:[%s2121_s2 + $0x8] sm:$0xff]  ;;  %v177_v19 = vshrl.u32 %v176_v18, 7  ;;  %vm1242_vm2 = vcmask 7168  }
  0x41   :  { %1412 = vmatpush3.msk.msra.mxu0 %vm301_vm0, %v268_v7  ;;  %v262_v16 = vld [vmem:[%s2121_s2] sm:$0xff]  ;;  %v424_v18 = vld [vmem:[#allocation3 + $0x30] sm:$0x3] }
  0x42   :  { %1413 = vmatprep.subr.mxu0 %v267_v8  ;;  %v178_v20 = vsub.s32 0, %v177_v19  ;;  %v236_v22 = vsub.s32 1, %v177_v19  ;;  %v1258_v26 = vld [vmem:[%s2128_s9] ss:$0 sm:$0xff]  ;;  %1437 = vmatprep.subr.msk.mxu1 %vm301_vm0, %v424_v18  ;;  %v423_v19 = vld [vmem:[#allocation3 + $0x28] sm:$0xff] }
  0x43   :  { %1414 = vmatpush3.msra.mxu0 %v267_v8  ;;  %1438 = vmatpush3.msk.msra.mxu1 %vm301_vm0, %v424_v18  ;;  %v732_v18 = vld [vmem:[#allocation7 + $0x30] sm:$0x3] }
  0x44   :  { %v126_v3 = vld [vmem:[%s2140_s21] sm:$0xff]  ;;  %v127_v4 = vld [vmem:[%s2140_s21 + $0x8] sm:$0xff]  ;;  %v128_v5 = vld [vmem:[%s2140_s21 + $0x10] sm:$0xff]  ;;  %1415 = vmatprep.subr.mxu0 %v266_v10  ;;  %1439 = vmatprep.subr.mxu1 %v423_v19 }
  0x45   :  { %203 = vperm.xlu1 %1577, %v126_v3   ;;  %138 = vperm.xlu0 %1576, %v126_v3   ;;  %v129_v6 = vld [vmem:[%s2140_s21 + $0x18] sm:$0xff]  ;;  %v131_v9 = vld [vmem:[%s2140_s21 + $0x28] sm:$0xff]  ;;  %v130_v11 = vld [vmem:[%s2140_s21 + $0x20] sm:$0xff] }
  0x46   :  { %v132_v13 = vld [vmem:[%s2140_s21 + $0x30] sm:$0xff]  ;;  %1416 = vmatpush3.msra.mxu0 %v266_v10  ;;  %v133_v17 = vld [vmem:[%s2140_s21 + $0x38] sm:$0xff]  ;;  %v134_v21 = vld [vmem:[%s2141_s27] sm:$0x3]  ;;  %1440 = vmatpush3.msra.mxu1 %v423_v19 }
  0x47   :  { %1417 = vmatprep.subr.mxu0 %v265_v12  ;;  %v179_v23 = vrot.slane %v134_v21, %v178_v20  ;;  %v1987_v24 = vrot.slane %v134_v21, %v236_v22  ;;  %v422_v20 = vld [vmem:[#allocation3 + $0x20] sm:$0xff]  ;;  %v421_v21 = vld [vmem:[#allocation3 + $0x18] sm:$0xff]  ;;  %v420_v22 = vld [vmem:[#allocation3 + $0x10] sm:$0xff] }
  0x48   :  { %1418 = vmatpush3.msra.mxu0 %v265_v12  ;;  %1441 = vmatprep.subr.mxu1 %v422_v20  ;;  %v731_v19 = vld [vmem:[#allocation7 + $0x28] sm:$0xff] }
  0x49   :  { %207 = vperm.xlu1 %1577, %v127_v4   ;;  %1579 = vset.pattern.permute.xlu0 %v1812_v1 }
  0x4a   :  { %211 = vperm.xlu0 %1579, %v128_v5   ;;  %1419 = vmatprep.subr.mxu0 %v264_v14 }
  0x4b   :  { %1420 = vmatpush3.msra.mxu0 %v264_v14  ;;  %1442 = vmatpush3.msra.mxu1 %v422_v20  ;;  %v730_v20 = vld [vmem:[#allocation7 + $0x20] sm:$0xff] }
  0x4c   :  { %1421 = vmatprep.subr.mxu0 %v263_v15  ;;  %1443 = vmatprep.subr.mxu1 %v421_v21 }
  0x4d   :  { %1578 = vset.pattern.permute.xlu1 %v1813_v2  ;;  %1422 = vmatpush3.msra.mxu0 %v263_v15 }
  0x4e   :  { %153 = vperm.xlu1 %1578, %v129_v6   ;;  %1580 = vset.pattern.permute.xlu0 %v1813_v2 }
  0x4f   :  { %143 = vperm.xlu0 %1580, %v127_v4   ;;  %1423 = vmatprep.subr.mxu0 %v262_v16 }
  0x50   :  { %1424 = vmatpush3.msra.mxu0 %v262_v16  ;;  %1444 = vmatpush3.msra.mxu1 %v421_v21  ;;  %v729_v21 = vld [vmem:[#allocation7 + $0x18] sm:$0xff] }
  0x51   :  { %1445 = vmatprep.subr.mxu1 %v420_v22 }
  0x52   :  { %1581 = vset.pattern.permute.xlu1 %v1812_v1  ;;  %1446 = vmatpush3.msra.mxu1 %v420_v22  ;;  %v728_v22 = vld [vmem:[#allocation7 + $0x10] sm:$0xff] }
  0x53   :  { %215 = vperm.xlu1 %1581, %v129_v6   ;;  %148 = vperm.xlu0 %1580, %v128_v5  }
  0x57   :  { %1582 = vset.pattern.permute.xlu1 %v1813_v2  ;;  %163 = vperm.xlu0 %1580, %v131_v9  }
  0x58   :  { %158 = vperm.xlu1 %1582, %v130_v11  }
  0x5b   :  { %168 = vperm.xlu0 %1580, %v132_v13  }
  0x5c   :  { %1583 = vset.pattern.permute.xlu1 %v1812_v1 }
  0x5d   :  { %219 = vperm.xlu1 %1583, %v130_v11  }
  0x5f   :  { %1585 = vset.pattern.permute.xlu0 %v1812_v1 }
  0x60   :  { %227 = vperm.xlu0 %1585, %v132_v13  }
  0x61   :  { %223 = vperm.xlu1 %1583, %v131_v9  }
  0x65   :  { %1584 = vset.pattern.permute.xlu1 %v1813_v2 }
  0x66   :  { %173 = vperm.xlu1 %1584, %v133_v17  }
  0x6a   :  { %1586 = vset.pattern.permute.xlu1 %v1812_v1 }
  0x6b   :  { %231 = vperm.xlu1 %1586, %v133_v17  }
  0xc0   :  { %v204_v25 = vpop.permute.xlu1 %203  ;;  %v139_v27 = vpop.permute.xlu0 %138 }
  0xc1   :  { %v180_v28 = vmul.f32 %v179_v23, %v139_v27  ;;  %v238_v29 = vmul.f32 %v1987_v24, %v204_v25  ;;  %v1259_v25 = vld [vmem:[%s2129_s10] ss:$0 sm:$0xff] }
  0xc3   :  { %v194_v30 = vadd.f32 %v1258_v26, %v180_v28 }
  0xc4   :  { %v208_v31 = vpop.permute.xlu1 %207 }
  0xc5   :  { %v246_v32 = vadd.f32 %v238_v29, %v194_v30  ;;  %v212_v33 = vpop.permute.xlu0 %211  ;;  %v239_v38 = vmul.f32 %v1987_v24, %v208_v31 }
  0xc6   :  { %v240_v42 = vmul.f32 %v1987_v24, %v212_v33 }
  0xc7   :  { %1587 = vtanh.f32 %v246_v32 }
  0xc9   :  { %v154_v34 = vpop.permute.xlu1 %153 }
  0xca   :  { %v144_v35 = vpop.permute.xlu0 %143  ;;  %v183_v37 = vmul.f32 %v179_v23, %v154_v34 }
  0xcb   :  { %v181_v36 = vmul.f32 %v179_v23, %v144_v35 }
  0xcc   :  { %v197_v46 = vadd.f32 %v1258_v26, %v183_v37 }
  0xcd   :  { %v195_v39 = vadd.f32 %v1258_v26, %v181_v36 }
  0xce   :  { %v216_v40 = vpop.permute.xlu1 %215  ;;  %v149_v41 = vpop.permute.xlu0 %148 }
  0xcf   :  { %v247_v43 = vadd.f32 %v239_v38, %v195_v39  ;;  %v241_v44 = vmul.f32 %v1987_v24, %v216_v40  ;;  %v182_v45 = vmul.f32 %v179_v23, %v149_v41 }
  0xd1   :  { %1589 = vtanh.f32 %v247_v43  ;;  %v196_v47 = vadd.f32 %v1258_v26, %v182_v45  ;;  %v249_v48 = vadd.f32 %v241_v44, %v197_v46 }
  0xd2   :  { %v164_v49 = vpop.permute.xlu0 %163 }
  0xd3   :  { %v248_v50 = vadd.f32 %v240_v42, %v196_v47  ;;  %v159_v51 = vpop.permute.xlu1 %158  ;;  %v185_v57 = vmul.f32 %v179_v23, %v164_v49 }
  0xd4   :  { %v1588_v52 = vpop.eup %1587  ;;  %v184_v53 = vmul.f32 %v179_v23, %v159_v51  ;;  %v577_v51 = vld [vmem:[#allocation5 + $0x28] sm:$0xff] }
  0xd5   :  { %1591 = vtanh.f32 %v248_v50  ;;  %1425 = vmatprep.mubr.msk.f32.mxu0 %vm276_vm1, %v1588_v52  ;;  %v199_v1 = vadd.f32 %v1258_v26, %v185_v57  ;;  %v578_v50 = vld [vmem:[#allocation5 + $0x30] sm:$0x3]  ;;  %v576_v52 = vld [vmem:[#allocation5 + $0x20] sm:$0xff] }
  0xd6   :  { %1593 = vtanh.f32 %v249_v48  ;;  %v169_v54 = vpop.permute.xlu0 %168  ;;  %v198_v58 = vadd.f32 %v1258_v26, %v184_v53  ;;  %1463 = vmatprep.subr.msk.mxu0 %vm301_vm0, %v578_v50  ;;  %v575_v53 = vld [vmem:[#allocation5 + $0x18] sm:$0xff]  ;;  %v1269_v57 = vld [vmem:[%s2130_s11] ss:$0 sm:$0xff] }
  0xd7   :  { %v186_v55 = vmul.f32 %v179_v23, %v169_v54  ;;  %v574_v54 = vld [vmem:[#allocation5 + $0x10] sm:$0xff] }
  0xd8   :  { %v220_v56 = vpop.permute.xlu1 %219 }
  0xd9   :  { %v242_v59 = vmul.f32 %v1987_v24, %v220_v56  ;;  %v200_v62 = vadd.f32 %v1258_v26, %v186_v55  ;;  %v573_v55 = vld [vmem:[#allocation5 + $0x8] sm:$0xff]  ;;  %v572_v56 = vld [vmem:[#allocation5] sm:$0xff] }
  0xdb   :  { %v250_v60 = vadd.f32 %v242_v59, %v198_v58  ;;  %v228_v61 = vpop.permute.xlu0 %227 }
  0xdc   :  { %v244_v63 = vmul.f32 %v1987_v24, %v228_v61  ;;  %v224_v0 = vpop.permute.xlu1 %223 }
  0xdd   :  { %1595 = vtanh.f32 %v250_v60  ;;  %v243_v2 = vmul.f32 %v1987_v24, %v224_v0 }
  0xde   :  { %v1590_v3 = vpop.eup %1589  ;;  %v252_v4 = vadd.f32 %v244_v63, %v200_v62 }
  0xdf   :  { %v251_v5 = vadd.f32 %v243_v2, %v199_v1  ;;  %1426 = vmatmul.mubr.msk.f32.vlgmr.msra.gmra.mxu0 %vm276_vm1, %v1590_v3 }
  0xe0   :  { %1464 = vmatpush3.msk.msra.mxu0 %vm301_vm0, %v578_v50  ;;  %v886_v50 = vld [vmem:[#allocation8 + $0x30] sm:$0x3] }
  0xe1   :  { %1597 = vtanh.f32 %v251_v5  ;;  %v174_v6 = vpop.permute.xlu1 %173  ;;  %1465 = vmatprep.subr.mxu0 %v577_v51 }
  0xe2   :  { %v1592_v7 = vpop.eup %1591  ;;  %1599 = vtanh.f32 %v252_v4  ;;  %v187_v9 = vmul.f32 %v179_v23, %v174_v6  ;;  %v419_v23 = vld [vmem:[#allocation3 + $0x8] sm:$0xff]  ;;  %1466 = vmatpush3.msra.mxu0 %v577_v51  ;;  %v885_v51 = vld [vmem:[#allocation8 + $0x28] sm:$0xff] }
  0xe3   :  { %v1594_v8 = vpop.eup %1593  ;;  %1428 = vmatprep.mubr.msk.f32.mxu0 %vm276_vm1, %v1592_v7  ;;  %1447 = vmatprep.subr.mxu1 %v419_v23 }
  0xe4   :  { %1429 = vmatmul.mubr.msk.f32.gmra.mxu0 %vm276_vm1, %v1594_v8  ;;  %v201_v11 = vadd.f32 %v1258_v26, %v187_v9  ;;  %1448 = vmatpush3.msra.mxu1 %v419_v23  ;;  %v727_v23 = vld [vmem:[#allocation7 + $0x8] sm:$0xff] }
  0xe5   :  { %1467 = vmatprep.subr.mxu0 %v576_v52 }
  0xe6   :  { %v232_v10 = vpop.permute.xlu1 %231  ;;  %1468 = vmatpush3.msra.mxu0 %v576_v52  ;;  %v884_v52 = vld [vmem:[#allocation8 + $0x20] sm:$0xff] }
  0xe7   :  { %v245_v12 = vmul.f32 %v1987_v24, %v232_v10  ;;  %v418_v24 = vld [vmem:[#allocation3] sm:$0xff]  ;;  %1469 = vmatprep.subr.mxu0 %v575_v53 }
  0xe8   :  { %1449 = vmatprep.subr.mxu1 %v418_v24  ;;  %1470 = vmatpush3.msra.mxu0 %v575_v53  ;;  %v883_v53 = vld [vmem:[#allocation8 + $0x18] sm:$0xff] }
  0xe9   :  { %v253_v13 = vadd.f32 %v245_v12, %v201_v11  ;;  %1450 = vmatpush3.msra.mxu1 %v418_v24  ;;  %1471 = vmatprep.subr.mxu0 %v574_v54  ;;  %v726_v24 = vld [vmem:[#allocation7] sm:$0xff] }
  0xea   :  { %v1596_v14 = vpop.eup %1595  ;;  %1472 = vmatpush3.msra.mxu0 %v574_v54  ;;  %1489 = vmatprep.subr.msk.mxu1 %vm301_vm0, %v732_v18  ;;  %v882_v54 = vld [vmem:[#allocation8 + $0x10] sm:$0xff] }
  0xeb   :  { %1601 = vtanh.f32 %v253_v13  ;;  %1431 = vmatprep.mubr.msk.f32.mxu0 %vm276_vm1, %v1596_v14  ;;  %1473 = vmatprep.subr.mxu0 %v573_v55 }
  0xec   :  { %1474 = vmatpush3.msra.mxu0 %v573_v55  ;;  %v881_v55 = vld [vmem:[#allocation8 + $0x8] sm:$0xff] }
  0xed   :  { %1475 = vmatprep.subr.mxu0 %v572_v56 }
  0xee   :  { %v1598_v15 = vpop.eup %1597  ;;  %1476 = vmatpush3.msra.mxu0 %v572_v56  ;;  %v880_v56 = vld [vmem:[#allocation8] sm:$0xff] }
  0xef   :  { %v1600_v16 = vpop.eup %1599  ;;  %1432 = vmatmul.mubr.msk.f32.gmra.mxu0 %vm276_vm1, %v1598_v15  ;;  %1515 = vmatprep.subr.msk.mxu0 %vm301_vm0, %v886_v50 }
  0xf0   :  { %1434 = vmatprep.mubr.msk.f32.mxu0 %vm276_vm1, %v1600_v16 }
  0xf8   :  { %v1602_v17 = vpop.eup %1601 }
  0xf9   :  { %1435 = vmatmul.mubr.msk.f32.gmra.mxu0 %vm276_vm1, %v1602_v17 }
 0x19f   :  { %v1427_v26 = vpop.f32.mrf.mxu0 }
 0x1a0   :  { %v377_v27 = vadd.f32 %v1427_v26, %v1259_v25 }
 0x1a1   :  { %v371_v28 = vpop.f32.mrf.mxu0 }
 0x1a2   :  { %v372_v29 = vadd.f32 %v1259_v25, %v371_v28 }
 0x1a4   :  { %1603 = vtanh.f32 %v372_v29  ;;  %v1430_v30 = vpop.f32.mrf.mxu0 }
 0x1a5   :  { %1605 = vtanh.f32 %v377_v27  ;;  %v387_v31 = vadd.f32 %v1430_v30, %v1259_v25 }
 0x1a6   :  { %v381_v32 = vpop.f32.mrf.mxu0 }
 0x1a7   :  { %v382_v33 = vadd.f32 %v1259_v25, %v381_v32 }
 0x1a9   :  { %1607 = vtanh.f32 %v382_v33 }
 0x1aa   :  { %1609 = vtanh.f32 %v387_v31 }
 0x1af   :  { %v1433_v34 = vpop.f32.mrf.mxu0 }
 0x1b0   :  { %v397_v36 = vadd.f32 %v1433_v34, %v1259_v25 }
 0x1b1   :  { %v1604_v35 = vpop.eup %1603  ;;  %v391_v37 = vpop.f32.mrf.mxu0 }
 0x1b2   :  { %v1606_v38 = vpop.eup %1605  ;;  %v392_v39 = vadd.f32 %v1259_v25, %v391_v37  ;;  %1451 = vmatprep.mubr.msk.f32.mxu1 %vm276_vm1, %v1604_v35 }
 0x1b3   :  { %1452 = vmatmul.mubr.msk.f32.vlgmr.msra.gmra.mxu1 %vm276_vm1, %v1606_v38 }
 0x1b4   :  { %1611 = vtanh.f32 %v392_v39  ;;  %1490 = vmatpush3.msk.msra.mxu1 %vm301_vm0, %v732_v18  ;;  %v1040_v18 = vld [vmem:[#allocation10 + $0x30] sm:$0x3] }
 0x1b5   :  { %1613 = vtanh.f32 %v397_v36  ;;  %1491 = vmatprep.subr.mxu1 %v731_v19 }
 0x1b6   :  { %v1608_v40 = vpop.eup %1607  ;;  %1492 = vmatpush3.msra.mxu1 %v731_v19  ;;  %v1039_v19 = vld [vmem:[#allocation10 + $0x28] sm:$0xff] }
 0x1b7   :  { %v1610_v41 = vpop.eup %1609  ;;  %1454 = vmatprep.mubr.msk.f32.mxu1 %vm276_vm1, %v1608_v40  ;;  %1493 = vmatprep.subr.mxu1 %v730_v20 }
 0x1b8   :  { %1455 = vmatmul.mubr.msk.f32.gmra.mxu1 %vm276_vm1, %v1610_v41 }
 0x1b9   :  { %v1436_v42 = vpop.f32.mrf.mxu0  ;;  %1494 = vmatpush3.msra.mxu1 %v730_v20  ;;  %v1038_v20 = vld [vmem:[#allocation10 + $0x20] sm:$0xff] }
 0x1ba   :  { %v407_v43 = vadd.f32 %v1436_v42, %v1259_v25  ;;  %1495 = vmatprep.subr.mxu1 %v729_v21 }
 0x1bb   :  { %v401_v44 = vpop.f32.mrf.mxu0  ;;  %1496 = vmatpush3.msra.mxu1 %v729_v21  ;;  %v1037_v21 = vld [vmem:[#allocation10 + $0x18] sm:$0xff] }
 0x1bc   :  { %v402_v45 = vadd.f32 %v1259_v25, %v401_v44  ;;  %1497 = vmatprep.subr.mxu1 %v728_v22  ;;  %v1279_v25 = vld [vmem:[%s2131_s12] ss:$0 sm:$0xff] }
 0x1bd   :  { %1498 = vmatpush3.msra.mxu1 %v728_v22  ;;  %v1036_v22 = vld [vmem:[#allocation10 + $0x10] sm:$0xff] }
 0x1be   :  { %1615 = vtanh.f32 %v402_v45  ;;  %1499 = vmatprep.subr.mxu1 %v727_v23 }
 0x1bf   :  { %1617 = vtanh.f32 %v407_v43  ;;  %1500 = vmatpush3.msra.mxu1 %v727_v23  ;;  %v1035_v23 = vld [vmem:[#allocation10 + $0x8] sm:$0xff] }
 0x1c0   :  { %1501 = vmatprep.subr.mxu1 %v726_v24 }
 0x1c1   :  { %v1612_v46 = vpop.eup %1611  ;;  %1502 = vmatpush3.msra.mxu1 %v726_v24  ;;  %v1034_v24 = vld [vmem:[#allocation10] sm:$0xff] }
 0x1c2   :  { %v1614_v47 = vpop.eup %1613  ;;  %1457 = vmatprep.mubr.msk.f32.mxu1 %vm276_vm1, %v1612_v46  ;;  %1541 = vmatprep.subr.msk.mxu1 %vm301_vm0, %v1040_v18 }
 0x1c3   :  { %1458 = vmatmul.mubr.msk.f32.gmra.mxu1 %vm276_vm1, %v1614_v47 }
 0x1cb   :  { %v1616_v48 = vpop.eup %1615 }
 0x1cc   :  { %v1618_v49 = vpop.eup %1617  ;;  %1460 = vmatprep.mubr.msk.f32.mxu1 %vm276_vm1, %v1616_v48 }
 0x1cd   :  { %1461 = vmatmul.mubr.msk.f32.gmra.mxu1 %vm276_vm1, %v1618_v49 }
 0x273   :  { %v1453_v58 = vpop.f32.mrf.mxu1 }
 0x274   :  { %v531_v59 = vadd.f32 %v1453_v58, %v1269_v57 }
 0x275   :  { %v525_v60 = vpop.f32.mrf.mxu1 }
 0x276   :  { %v526_v61 = vadd.f32 %v1269_v57, %v525_v60 }
 0x278   :  { %1619 = vtanh.f32 %v526_v61  ;;  %v1456_v62 = vpop.f32.mrf.mxu1 }
 0x279   :  { %1621 = vtanh.f32 %v531_v59  ;;  %v541_v63 = vadd.f32 %v1456_v62, %v1269_v57 }
 0x27a   :  { %v535_v0 = vpop.f32.mrf.mxu1 }
 0x27b   :  { %v536_v1 = vadd.f32 %v1269_v57, %v535_v0 }
 0x27d   :  { %1623 = vtanh.f32 %v536_v1 }
 0x27e   :  { %1625 = vtanh.f32 %v541_v63 }
 0x283   :  { %v1459_v2 = vpop.f32.mrf.mxu1 }
 0x284   :  { %v551_v4 = vadd.f32 %v1459_v2, %v1269_v57 }
 0x285   :  { %v1620_v3 = vpop.eup %1619  ;;  %v545_v5 = vpop.f32.mrf.mxu1 }
 0x286   :  { %v1622_v6 = vpop.eup %1621  ;;  %v546_v7 = vadd.f32 %v1269_v57, %v545_v5  ;;  %1477 = vmatprep.mubr.msk.f32.mxu0 %vm276_vm1, %v1620_v3 }
 0x287   :  { %1478 = vmatmul.mubr.msk.f32.vlgmr.msra.gmra.mxu0 %vm276_vm1, %v1622_v6 }
 0x288   :  { %1627 = vtanh.f32 %v546_v7  ;;  %1516 = vmatpush3.msk.msra.mxu0 %vm301_vm0, %v886_v50  ;;  %v1309_v50 = vld [vmem:[%s2134_s15] ss:$0 sm:$0xff] }
 0x289   :  { %1629 = vtanh.f32 %v551_v4  ;;  %1517 = vmatprep.subr.mxu0 %v885_v51 }
 0x28a   :  { %v1624_v8 = vpop.eup %1623  ;;  %1518 = vmatpush3.msra.mxu0 %v885_v51 }
 0x28b   :  { %v1626_v9 = vpop.eup %1625  ;;  %1480 = vmatprep.mubr.msk.f32.mxu0 %vm276_vm1, %v1624_v8  ;;  %1519 = vmatprep.subr.mxu0 %v884_v52 }
 0x28c   :  { %1481 = vmatmul.mubr.msk.f32.gmra.mxu0 %vm276_vm1, %v1626_v9 }
 0x28d   :  { %v1462_v10 = vpop.f32.mrf.mxu1  ;;  %1520 = vmatpush3.msra.mxu0 %v884_v52 }
 0x28e   :  { %v561_v11 = vadd.f32 %v1462_v10, %v1269_v57  ;;  %1521 = vmatprep.subr.mxu0 %v883_v53 }
 0x28f   :  { %v555_v12 = vpop.f32.mrf.mxu1  ;;  %1522 = vmatpush3.msra.mxu0 %v883_v53 }
 0x290   :  { %v556_v13 = vadd.f32 %v1269_v57, %v555_v12  ;;  %1523 = vmatprep.subr.mxu0 %v882_v54  ;;  %v1289_v57 = vld [vmem:[%s2132_s13] ss:$0 sm:$0xff] }
 0x291   :  { %1524 = vmatpush3.msra.mxu0 %v882_v54 }
 0x292   :  { %1631 = vtanh.f32 %v556_v13  ;;  %1525 = vmatprep.subr.mxu0 %v881_v55 }
 0x293   :  { %1633 = vtanh.f32 %v561_v11  ;;  %1526 = vmatpush3.msra.mxu0 %v881_v55 }
 0x294   :  { %1527 = vmatprep.subr.mxu0 %v880_v56 }
 0x295   :  { %v1628_v14 = vpop.eup %1627  ;;  %1528 = vmatpush3.msra.mxu0 %v880_v56 }
 0x296   :  { %v1630_v15 = vpop.eup %1629  ;;  %1483 = vmatprep.mubr.msk.f32.mxu0 %vm276_vm1, %v1628_v14 }
 0x297   :  { %1484 = vmatmul.mubr.msk.f32.gmra.mxu0 %vm276_vm1, %v1630_v15 }
 0x29f   :  { %v1632_v16 = vpop.eup %1631 }
 0x2a0   :  { %v1634_v17 = vpop.eup %1633  ;;  %1486 = vmatprep.mubr.msk.f32.mxu0 %vm276_vm1, %v1632_v16 }
 0x2a1   :  { %1487 = vmatmul.mubr.msk.f32.gmra.mxu0 %vm276_vm1, %v1634_v17 }
 0x347   :  { %v1479_v26 = vpop.f32.mrf.mxu0 }
 0x348   :  { %v685_v27 = vadd.f32 %v1479_v26, %v1279_v25 }
 0x349   :  { %v679_v28 = vpop.f32.mrf.mxu0 }
 0x34a   :  { %v680_v29 = vadd.f32 %v1279_v25, %v679_v28 }
 0x34c   :  { %1635 = vtanh.f32 %v680_v29  ;;  %v1482_v30 = vpop.f32.mrf.mxu0 }
 0x34d   :  { %1637 = vtanh.f32 %v685_v27  ;;  %v695_v31 = vadd.f32 %v1482_v30, %v1279_v25 }
 0x34e   :  { %v689_v32 = vpop.f32.mrf.mxu0 }
 0x34f   :  { %v690_v33 = vadd.f32 %v1279_v25, %v689_v32 }
 0x351   :  { %1639 = vtanh.f32 %v690_v33 }
 0x352   :  { %1641 = vtanh.f32 %v695_v31 }
 0x357   :  { %v1485_v34 = vpop.f32.mrf.mxu0 }
 0x358   :  { %v705_v36 = vadd.f32 %v1485_v34, %v1279_v25 }
 0x359   :  { %v1636_v35 = vpop.eup %1635  ;;  %v699_v37 = vpop.f32.mrf.mxu0 }
 0x35a   :  { %v1638_v38 = vpop.eup %1637  ;;  %v700_v39 = vadd.f32 %v1279_v25, %v699_v37  ;;  %1503 = vmatprep.mubr.msk.f32.mxu1 %vm276_vm1, %v1636_v35 }
 0x35b   :  { %1504 = vmatmul.mubr.msk.f32.vlgmr.msra.gmra.mxu1 %vm276_vm1, %v1638_v38 }
 0x35c   :  { %1643 = vtanh.f32 %v700_v39  ;;  %1542 = vmatpush3.msk.msra.mxu1 %vm301_vm0, %v1040_v18 }
 0x35d   :  { %1645 = vtanh.f32 %v705_v36  ;;  %1543 = vmatprep.subr.mxu1 %v1039_v19 }
 0x35e   :  { %v1640_v40 = vpop.eup %1639  ;;  %1544 = vmatpush3.msra.mxu1 %v1039_v19 }
 0x35f   :  { %v1642_v41 = vpop.eup %1641  ;;  %1506 = vmatprep.mubr.msk.f32.mxu1 %vm276_vm1, %v1640_v40  ;;  %1545 = vmatprep.subr.mxu1 %v1038_v20 }
 0x360   :  { %1507 = vmatmul.mubr.msk.f32.gmra.mxu1 %vm276_vm1, %v1642_v41 }
 0x361   :  { %v1488_v42 = vpop.f32.mrf.mxu0  ;;  %1546 = vmatpush3.msra.mxu1 %v1038_v20 }
 0x362   :  { %v715_v43 = vadd.f32 %v1488_v42, %v1279_v25  ;;  %1547 = vmatprep.subr.mxu1 %v1037_v21 }
 0x363   :  { %v709_v44 = vpop.f32.mrf.mxu0  ;;  %1548 = vmatpush3.msra.mxu1 %v1037_v21 }
 0x364   :  { %v710_v45 = vadd.f32 %v1279_v25, %v709_v44  ;;  %1549 = vmatprep.subr.mxu1 %v1036_v22  ;;  %v1299_v25 = vld [vmem:[%s2133_s14] ss:$0 sm:$0xff] }
 0x365   :  { %1550 = vmatpush3.msra.mxu1 %v1036_v22 }
 0x366   :  { %1647 = vtanh.f32 %v710_v45  ;;  %1551 = vmatprep.subr.mxu1 %v1035_v23 }
 0x367   :  { %1649 = vtanh.f32 %v715_v43  ;;  %1552 = vmatpush3.msra.mxu1 %v1035_v23 }
 0x368   :  { %1553 = vmatprep.subr.mxu1 %v1034_v24 }
 0x369   :  { %v1644_v46 = vpop.eup %1643  ;;  %1554 = vmatpush3.msra.mxu1 %v1034_v24 }
 0x36a   :  { %v1646_v47 = vpop.eup %1645  ;;  %1509 = vmatprep.mubr.msk.f32.mxu1 %vm276_vm1, %v1644_v46 }
 0x36b   :  { %1510 = vmatmul.mubr.msk.f32.gmra.mxu1 %vm276_vm1, %v1646_v47 }
 0x373   :  { %v1648_v48 = vpop.eup %1647 }
 0x374   :  { %v1650_v49 = vpop.eup %1649  ;;  %1512 = vmatprep.mubr.msk.f32.mxu1 %vm276_vm1, %v1648_v48 }
 0x375   :  { %1513 = vmatmul.mubr.msk.f32.gmra.mxu1 %vm276_vm1, %v1650_v49 }
 0x41b   :  { %v1505_v58 = vpop.f32.mrf.mxu1 }
 0x41c   :  { %v839_v59 = vadd.f32 %v1505_v58, %v1289_v57 }
 0x41d   :  { %v833_v60 = vpop.f32.mrf.mxu1 }
 0x41e   :  { %v834_v61 = vadd.f32 %v1289_v57, %v833_v60 }
 0x420   :  { %1651 = vtanh.f32 %v834_v61  ;;  %v1508_v62 = vpop.f32.mrf.mxu1 }
 0x421   :  { %1653 = vtanh.f32 %v839_v59  ;;  %v849_v63 = vadd.f32 %v1508_v62, %v1289_v57  ;;  %v1319_v59 = vld [vmem:[%s2127_s8] ss:$0 sm:$0xff] }
 0x422   :  { %v843_v0 = vpop.f32.mrf.mxu1 }
 0x423   :  { %v844_v1 = vadd.f32 %v1289_v57, %v843_v0 }
 0x425   :  { %1655 = vtanh.f32 %v844_v1 }
 0x426   :  { %1657 = vtanh.f32 %v849_v63 }
 0x42b   :  { %v1511_v2 = vpop.f32.mrf.mxu1 }
 0x42c   :  { %v859_v4 = vadd.f32 %v1511_v2, %v1289_v57 }
 0x42d   :  { %v1652_v3 = vpop.eup %1651  ;;  %v853_v5 = vpop.f32.mrf.mxu1 }
 0x42e   :  { %v1654_v6 = vpop.eup %1653  ;;  %v854_v7 = vadd.f32 %v1289_v57, %v853_v5  ;;  %1529 = vmatprep.mubr.msk.f32.mxu0 %vm276_vm1, %v1652_v3 }
 0x42f   :  { %1530 = vmatmul.mubr.msk.f32.vlgmr.msra.gmra.mxu0 %vm276_vm1, %v1654_v6 }
 0x430   :  { %1659 = vtanh.f32 %v854_v7 }
 0x431   :  { %1661 = vtanh.f32 %v859_v4 }
 0x432   :  { %v1656_v8 = vpop.eup %1655 }
 0x433   :  { %v1658_v9 = vpop.eup %1657  ;;  %1532 = vmatprep.mubr.msk.f32.mxu0 %vm276_vm1, %v1656_v8 }
 0x434   :  { %1533 = vmatmul.mubr.msk.f32.gmra.mxu0 %vm276_vm1, %v1658_v9 }
 0x435   :  { %v1514_v10 = vpop.f32.mrf.mxu1 }
 0x436   :  { %v869_v11 = vadd.f32 %v1514_v10, %v1289_v57 }
 0x437   :  { %v863_v12 = vpop.f32.mrf.mxu1 }
 0x438   :  { %v864_v13 = vadd.f32 %v1289_v57, %v863_v12 }
 0x43a   :  { %1663 = vtanh.f32 %v864_v13 }
 0x43b   :  { %1665 = vtanh.f32 %v869_v11 }
 0x43d   :  { %v1660_v14 = vpop.eup %1659 }
 0x43e   :  { %v1662_v15 = vpop.eup %1661  ;;  %1535 = vmatprep.mubr.msk.f32.mxu0 %vm276_vm1, %v1660_v14 }
 0x43f   :  { %1536 = vmatmul.mubr.msk.f32.gmra.mxu0 %vm276_vm1, %v1662_v15 }
 0x447   :  { %v1664_v16 = vpop.eup %1663 }
 0x448   :  { %v1666_v17 = vpop.eup %1665  ;;  %1538 = vmatprep.mubr.msk.f32.mxu0 %vm276_vm1, %v1664_v16 }
 0x449   :  { %1539 = vmatmul.mubr.msk.f32.gmra.mxu0 %vm276_vm1, %v1666_v17 }
 0x4ef   :  { %v1531_v26 = vpop.f32.mrf.mxu0 }
 0x4f0   :  { %v993_v27 = vadd.f32 %v1531_v26, %v1299_v25 }
 0x4f1   :  { %v987_v28 = vpop.f32.mrf.mxu0 }
 0x4f2   :  { %v988_v29 = vadd.f32 %v1299_v25, %v987_v28  ;;  %v1320_v28 = vld [vmem:[#allocation2] ss:$0 sm:$0xff] }
 0x4f4   :  { %1667 = vtanh.f32 %v988_v29  ;;  %v1534_v30 = vpop.f32.mrf.mxu0 }
 0x4f5   :  { %1669 = vtanh.f32 %v993_v27  ;;  %v1003_v31 = vadd.f32 %v1534_v30, %v1299_v25 }
 0x4f6   :  { %v997_v32 = vpop.f32.mrf.mxu0 }
 0x4f7   :  { %v998_v33 = vadd.f32 %v1299_v25, %v997_v32 }
 0x4f9   :  { %1671 = vtanh.f32 %v998_v33 }
 0x4fa   :  { %1673 = vtanh.f32 %v1003_v31 }
 0x4ff   :  { %v1537_v34 = vpop.f32.mrf.mxu0 }
 0x500   :  { %v1013_v36 = vadd.f32 %v1537_v34, %v1299_v25 }
 0x501   :  { %v1668_v35 = vpop.eup %1667  ;;  %v1007_v37 = vpop.f32.mrf.mxu0 }
 0x502   :  { %v1670_v38 = vpop.eup %1669  ;;  %v1008_v39 = vadd.f32 %v1299_v25, %v1007_v37  ;;  %1555 = vmatprep.mubr.msk.f32.mxu1 %vm276_vm1, %v1668_v35 }
 0x503   :  { %1556 = vmatmul.mubr.msk.f32.vlgmr.msra.gmra.mxu1 %vm276_vm1, %v1670_v38 }
 0x504   :  { %1675 = vtanh.f32 %v1008_v39 }
 0x505   :  { %1677 = vtanh.f32 %v1013_v36 }
 0x506   :  { %v1672_v40 = vpop.eup %1671 }
 0x507   :  { %v1674_v41 = vpop.eup %1673  ;;  %1558 = vmatprep.mubr.msk.f32.mxu1 %vm276_vm1, %v1672_v40 }
 0x508   :  { %1559 = vmatmul.mubr.msk.f32.gmra.mxu1 %vm276_vm1, %v1674_v41 }
 0x509   :  { %v1540_v42 = vpop.f32.mrf.mxu0 }
 0x50a   :  { %v1023_v43 = vadd.f32 %v1540_v42, %v1299_v25 }
 0x50b   :  { %v1017_v44 = vpop.f32.mrf.mxu0 }
 0x50c   :  { %v1018_v45 = vadd.f32 %v1299_v25, %v1017_v44 }
 0x50e   :  { %1679 = vtanh.f32 %v1018_v45 }
 0x50f   :  { %1681 = vtanh.f32 %v1023_v43 }
 0x511   :  { %v1676_v46 = vpop.eup %1675 }
 0x512   :  { %v1678_v47 = vpop.eup %1677  ;;  %1561 = vmatprep.mubr.msk.f32.mxu1 %vm276_vm1, %v1676_v46 }
 0x513   :  { %1562 = vmatmul.mubr.msk.f32.gmra.mxu1 %vm276_vm1, %v1678_v47 }
 0x51b   :  { %v1680_v48 = vpop.eup %1679 }
 0x51c   :  { %v1682_v49 = vpop.eup %1681  ;;  %1564 = vmatprep.mubr.msk.f32.mxu1 %vm276_vm1, %v1680_v48 }
 0x51d   :  { %1565 = vmatmul.mubr.msk.f32.gmra.mxu1 %vm276_vm1, %v1682_v49 }
 0x5c3   :  { %v1557_v51 = vpop.f32.mrf.mxu1 }
 0x5c4   :  { %v1147_v52 = vadd.f32 %v1557_v51, %v1309_v50 }
 0x5c5   :  { %v1141_v53 = vpop.f32.mrf.mxu1 }
 0x5c6   :  { %1683 = vtanh.f32 %v1147_v52  ;;  %v1142_v54 = vadd.f32 %v1309_v50, %v1141_v53 }
 0x5c8   :  { %1685 = vtanh.f32 %v1142_v54  ;;  %v1560_v55 = vpop.f32.mrf.mxu1 }
 0x5c9   :  { %v1157_v56 = vadd.f32 %v1560_v55, %v1309_v50 }
 0x5ca   :  { %v1151_v57 = vpop.f32.mrf.mxu1 }
 0x5cb   :  { %1687 = vtanh.f32 %v1157_v56  ;;  %v1152_v58 = vadd.f32 %v1309_v50, %v1151_v57 }
 0x5cd   :  { %1689 = vtanh.f32 %v1152_v58 }
 0x5d3   :  { %v1684_v60 = vpop.eup %1683  ;;  %v1563_v61 = vpop.f32.mrf.mxu1 }
 0x5d4   :  { %v1167_v62 = vadd.f32 %v1563_v61, %v1309_v50  ;;  %v1196_v63 = vmul.f32 %v1684_v60, %v1319_v59 }
 0x5d5   :  { %v1686_v0 = vpop.eup %1685  ;;  %v1161_v1 = vpop.f32.mrf.mxu1 }
 0x5d6   :  { %1691 = vtanh.f32 %v1167_v62  ;;  %v1162_v2 = vadd.f32 %v1309_v50, %v1161_v1  ;;  %v1206_v3 = vsel %vm276_vm1, %v1196_v63, 0.0  ;;  %v1195_v4 = vmul.f32 %v1686_v0, %v1319_v59 }
 0x5d7   :  { %1207 = vadd.xlane.f32.xlu0 %v1206_v3 }
 0x5d8   :  { %v1688_v5 = vpop.eup %1687  ;;  %1693 = vtanh.f32 %v1162_v2  ;;  %v1203_v6 = vsel %vm276_vm1, %v1195_v4, 0.0 }
 0x5d9   :  { %1204 = vadd.xlane.f32.xlu1 %v1203_v6  ;;  %v1198_v7 = vmul.f32 %v1688_v5, %v1319_v59 }
 0x5da   :  { %v1690_v8 = vpop.eup %1689 }
 0x5db   :  { %v1212_v9 = vsel %vm276_vm1, %v1198_v7, 0.0  ;;  %v1197_v10 = vmul.f32 %v1690_v8, %v1319_v59 }
 0x5dd   :  { %1213 = vadd.xlane.f32.xlu1 %v1212_v9  ;;  %v1566_v11 = vpop.f32.mrf.mxu1  ;;  %v1209_v12 = vsel %vm276_vm1, %v1197_v10, 0.0 }
 0x5de   :  { %v1177_v13 = vadd.f32 %v1566_v11, %v1309_v50  ;;  %1210 = vadd.xlane.f32.xlu0 %v1209_v12 }
 0x5df   :  { %v1171_v14 = vpop.f32.mrf.mxu1 }
 0x5e0   :  { %1695 = vtanh.f32 %v1177_v13  ;;  %v1172_v15 = vadd.f32 %v1309_v50, %v1171_v14 }
 0x5e2   :  { %1697 = vtanh.f32 %v1172_v15 }
 0x5e3   :  { %v1692_v16 = vpop.eup %1691 }
 0x5e4   :  { %v1200_v17 = vmul.f32 %v1692_v16, %v1319_v59 }
 0x5e5   :  { %v1694_v18 = vpop.eup %1693 }
 0x5e6   :  { %v1218_v19 = vsel %vm276_vm1, %v1200_v17, 0.0  ;;  %v1199_v20 = vmul.f32 %v1694_v18, %v1319_v59 }
 0x5e7   :  { %1219 = vadd.xlane.f32.xlu1 %v1218_v19 }
 0x5e8   :  { %v1215_v21 = vsel %vm276_vm1, %v1199_v20, 0.0 }
 0x5e9   :  { %1216 = vadd.xlane.f32.xlu0 %v1215_v21 }
 0x5ed   :  { %v1696_v22 = vpop.eup %1695 }
 0x5ee   :  { %v1202_v23 = vmul.f32 %v1696_v22, %v1319_v59 }
 0x5ef   :  { %v1698_v24 = vpop.eup %1697 }
 0x5f0   :  { %v1224_v25 = vsel %vm276_vm1, %v1202_v23, 0.0  ;;  %v1201_v26 = vmul.f32 %v1698_v24, %v1319_v59 }
 0x5f1   :  { %1225 = vadd.xlane.f32.xlu1 %v1224_v25 }
 0x5f2   :  { %v1221_v27 = vsel %vm276_vm1, %v1201_v26, 0.0 }
 0x5f3   :  { %1222 = vadd.xlane.f32.xlu0 %v1221_v27 }
 0x660   :  { %v1208_v29 = vpop.xlane.xlu0 %1207 }
 0x661   :  { %v1235_v30 = vadd.f32 %v1320_v28, %v1208_v29 }
 0x662   :  { %v1205_v31 = vpop.xlane.xlu1 %1204 }
 0x663   :  { %1244 = vst.msk [vmem:[%s2136_s17 + $0x8] sm:$0xff] %vm1242_vm2, %v1235_v30  ;;  %v1234_v32 = vadd.f32 %v1320_v28, %v1205_v31 }
 0x665   :  { %1243 = vst.msk [vmem:[%s2136_s17] sm:$0xff] %vm1242_vm2, %v1234_v32 }
 0x666   :  { %v1214_v33 = vpop.xlane.xlu1 %1213 }
 0x667   :  { %v1237_v34 = vadd.f32 %v1320_v28, %v1214_v33  ;;  %v1211_v35 = vpop.xlane.xlu0 %1210 }
 0x668   :  { %v1236_v36 = vadd.f32 %v1320_v28, %v1211_v35 }
 0x669   :  { %1246 = vst.msk [vmem:[%s2136_s17 + $0x18] sm:$0xff] %vm1242_vm2, %v1237_v34 }
 0x66a   :  { %1245 = vst.msk [vmem:[%s2136_s17 + $0x10] sm:$0xff] %vm1242_vm2, %v1236_v36 }
 0x670   :  { %v1220_v37 = vpop.xlane.xlu1 %1219 }
 0x671   :  { %v1239_v38 = vadd.f32 %v1320_v28, %v1220_v37 }
 0x672   :  { %v1217_v39 = vpop.xlane.xlu0 %1216 }
 0x673   :  { %1248 = vst.msk [vmem:[%s2136_s17 + $0x28] sm:$0xff] %vm1242_vm2, %v1239_v38  ;;  %v1238_v40 = vadd.f32 %v1320_v28, %v1217_v39 }
 0x675   :  { %1247 = vst.msk [vmem:[%s2136_s17 + $0x20] sm:$0xff] %vm1242_vm2, %v1238_v40 }
 0x67a   :  { %v1226_v41 = vpop.xlane.xlu1 %1225 }
 0x67b   :  { %v1241_v42 = vadd.f32 %v1320_v28, %v1226_v41 }
 0x67c   :  { %v1223_v43 = vpop.xlane.xlu0 %1222 }
 0x67d   :  { %1250 = vst.msk [vmem:[%s2136_s17 + $0x38] sm:$0xff] %vm1242_vm2, %v1241_v42  ;;  %v1240_v44 = vadd.f32 %v1320_v28, %v1223_v43 }
 0x67f   :  { %1249 = vst.msk [vmem:[%s2136_s17 + $0x30] sm:$0xff] %vm1242_vm2, %v1240_v44 }
 0x680   :  { %1255 = vsyncpa [#allocation4], 1 }
 0x681   :  { %1256 = vsyncpa [#allocation6], 1 }
 0x682   :  { %1257 = vsyncpa [#allocation9], 1 }

</bundles_post_ra>
